<compile_context>
chip_gen: v5e
topology: v5e:2x2
jax: 0.10.0
libtpu: 0.0.40
codegen_flags: <defaults>
</compile_context>

<pallas_src>
import functools
import math

import jax
import jax.numpy as jnp
from jax.experimental import pallas as pl
from jax.experimental.pallas import tpu as pltpu

HID = 500            # LSTM hidden size (module: self.hidden_size)
HP = 512             # hidden padded to a multiple of 128 lanes
NUM_LAYERS = 3       # module: self.num_layers
EMBED = 100          # module: self.embed_dim
EP = 128             # embedding dim padded to 128 lanes
CP = 128             # num_classes padded to 128 lanes (lane-dense out tile)
PAD_ID = 1           # KoBERT vocab '[PAD]' index
VMEM_LIMIT = 48 * 1024 * 1024   # <= v7x 64 MiB physical VMEM
# TODO(synk): get_kobert_model() loads a checkpoint/vocab from disk; replaced by
# a fixed pad id and deterministic in-script parameter init.


# ---------------------------------------------------------------------------
# Pallas kernels
# ---------------------------------------------------------------------------
def _in_proj_kernel(x_ref, w_ref, b_ref, g_ref):
    """gates_x = x @ W_ih^T + b for one direction (grid axis = direction)."""
    g_ref[...] = (jnp.dot(x_ref[...], w_ref[...],
                          preferred_element_type=jnp.float32) + b_ref[...])


def input_proj(x2d_bf16, wihT, bias):
    """x2d_bf16: (M, Dp) bf16; wihT: (2, Dp, 4HP) bf16; bias: (2, 1, 4HP) f32.

    Returns gates_x: (2, M, 4HP) f32.
    """
    M, Dp = x2d_bf16.shape
    return pl.pallas_call(
        _in_proj_kernel,
        out_shape=jax.ShapeDtypeStruct((2, M, 4 * HP), jnp.float32),
        grid=(2,),
        in_specs=[
            pl.BlockSpec((M, Dp), lambda d: (0, 0)),                 # shared x
            pl.BlockSpec((None, Dp, 4 * HP), lambda d: (d, 0, 0)),   # W_ih^T[d]
            pl.BlockSpec((None, 1, 4 * HP), lambda d: (d, 0, 0)),    # bias[d]
        ],
        out_specs=pl.BlockSpec((None, M, 4 * HP), lambda d: (d, 0, 0)),
        compiler_params=pltpu.CompilerParams(
            dimension_semantics=("parallel",),
            vmem_limit_bytes=VMEM_LIMIT,
        ),
    )(x2d_bf16, wihT, bias)


def _lstm_rec_kernel(gx_ref, whh_ref, h0_ref, c0_ref, mask_ref, y_ref, *,
                     t_total):
    """One bidirectional LSTM layer; grid axis = direction, time loop inside."""
    d = pl.program_id(0)
    rev = d > 0

    def step(s, carry):
        h_prev, c_prev = carry
        t = jnp.where(rev, t_total - 1 - s, s)        # actual time step

        gates = gx_ref[t] + jnp.dot(h_prev.astype(jnp.bfloat16), whh_ref[...],
                                    preferred_element_type=jnp.float32)
        i = jax.nn.sigmoid(gates[:, 0 * HP:1 * HP])
        f = jax.nn.sigmoid(gates[:, 1 * HP:2 * HP])
        g = jnp.tanh(gates[:, 2 * HP:3 * HP])
        o = jax.nn.sigmoid(gates[:, 3 * HP:4 * HP])

        c_new = f * c_prev + i * g
        h_new = o * jnp.tanh(c_new)

        m = mask_ref[t]                                # (B, 1), 1.0 if t < len
        c_next = m * c_new + (1.0 - m) * c_prev
        h_next = m * h_new + (1.0 - m) * h_prev
        y_ref[t] = m * h_new                           # zero at padded steps
        return (h_next, c_next)

    jax.lax.fori_loop(0, t_total, step, (h0_ref[...], c0_ref[...]))


def lstm_layer(gx, whhT, h0p, c0p, tmask):
    """gx: (2, T, B, 4HP) f32; whhT: (2, HP, 4HP) bf16; h0p/c0p: (2, B, HP);
    tmask: (T, B, 1) f32.  Returns (T, B, 2*HP) f32 (fwd | bwd feature halves).
    """
    _, T, B, _ = gx.shape
    kernel = functools.partial(_lstm_rec_kernel, t_total=T)
    return pl.pallas_call(
        kernel,
        out_shape=jax.ShapeDtypeStruct((T, B, 2 * HP), jnp.float32),
        grid=(2,),
        in_specs=[
            pl.BlockSpec((None, T, B, 4 * HP), lambda d: (d, 0, 0, 0)),  # gx[d]
            pl.BlockSpec((None, HP, 4 * HP), lambda d: (d, 0, 0)),       # W_hh^T
            pl.BlockSpec((None, B, HP), lambda d: (d, 0, 0)),            # h0[d]
            pl.BlockSpec((None, B, HP), lambda d: (d, 0, 0)),            # c0[d]
            pl.BlockSpec((T, B, 1), lambda d: (0, 0, 0)),                # mask
        ],
        out_specs=pl.BlockSpec((T, B, HP), lambda d: (0, 0, d)),
        compiler_params=pltpu.CompilerParams(
            dimension_semantics=("parallel",),     # 2 dirs -> 2 TCs on v7x
            vmem_limit_bytes=VMEM_LIMIT,
        ),
    )(gx, whhT, h0p, c0p, tmask)


def _linear_kernel(x_ref, w_ref, b_ref, o_ref):
    o_ref[...] = (jnp.dot(x_ref[...], w_ref[...],
                          preferred_element_type=jnp.float32) + b_ref[...])


def linear_pallas(x2d, w, b):
    """x2d: (M, HP) f32; w: (HP, CP) f32 (zero pad rows/cols); b: (1, CP)."""
    M, K = x2d.shape
    _, C = w.shape
    return pl.pallas_call(
        _linear_kernel,
        out_shape=jax.ShapeDtypeStruct((M, C), jnp.float32),
        grid=(1,),
        in_specs=[pl.BlockSpec((M, K), lambda i: (0, 0)),
                  pl.BlockSpec((K, C), lambda i: (0, 0)),
                  pl.BlockSpec((1, C), lambda i: (0, 0))],
        out_specs=pl.BlockSpec((M, C), lambda i: (0, 0)),
        compiler_params=pltpu.CompilerParams(vmem_limit_bytes=VMEM_LIMIT),
    )(x2d, w, b)


# ---------------------------------------------------------------------------
# Parameter construction (deterministic, PyTorch-shaped then padded for TPU)
# ---------------------------------------------------------------------------
def pad_lstm_weights(w_ih, w_hh, bias, first_layer):
    """w_ih:(4H,Din), w_hh:(4H,H), bias:(4H,) -> transposed, padded, bf16."""
    din_p = EP if first_layer else 2 * HP
    wihT = jnp.zeros((din_p, 4 * HP), jnp.float32)
    whhT = jnp.zeros((HP, 4 * HP), jnp.float32)
    bp = jnp.zeros((1, 4 * HP), jnp.float32)
    for g in range(4):
        col = slice(g * HP, g * HP + HID)
        wg = w_ih[g * HID:(g + 1) * HID, :]                 # (HID, Din)
        if first_layer:
            wihT = wihT.at[:EMBED, col].set(wg.T)
        else:
            # input features: [0:HID] fwd hidden, [HID:2HID] bwd hidden ->
            # padded layout: fwd rows 0:HP, bwd rows HP:2HP
            wihT = wihT.at[:HID, col].set(wg[:, :HID].T)
            wihT = wihT.at[HP:HP + HID, col].set(wg[:, HID:].T)
        whhT = whhT.at[:HID, col].set(w_hh[g * HID:(g + 1) * HID, :].T)
        bp = bp.at[0, col].set(bias[g * HID:(g + 1) * HID])
    # bf16 weights: halves weight bytes / VMEM, MXU-friendly; f32 accumulation.
    return wihT.astype(jnp.bfloat16), whhT.astype(jnp.bfloat16), bp


def init_params(key, vocab_size, num_classes):
    keys = iter(jax.random.split(key, 64))
    params = {}
    params["embed"] = jax.random.normal(next(keys), (vocab_size, EMBED),
                                        jnp.float32)
    k = 1.0 / math.sqrt(HID)
    layers = []
    for l in range(NUM_LAYERS):
        din = EMBED if l == 0 else 2 * HID
        wiTs, whTs, bs = [], [], []
        for _d in range(2):  # 0 = forward, 1 = reverse
            w_ih = jax.random.uniform(next(keys), (4 * HID, din),
                                      jnp.float32, -k, k)
            w_hh = jax.random.uniform(next(keys), (4 * HID, HID),
                                      jnp.float32, -k, k)
            b_ih = jax.random.uniform(next(keys), (4 * HID,),
                                      jnp.float32, -k, k)
            b_hh = jax.random.uniform(next(keys), (4 * HID,),
                                      jnp.float32, -k, k)
            wihT, whhT, bp = pad_lstm_weights(w_ih, w_hh, b_ih + b_hh,
                                              first_layer=(l == 0))
            wiTs.append(wihT); whTs.append(whhT); bs.append(bp)
        layers.append((jnp.stack(wiTs), jnp.stack(whTs), jnp.stack(bs)))
    params["lstm"] = layers
    out_w = jax.random.uniform(next(keys), (num_classes, HID),
                               jnp.float32, -k, k)
    out_b = jax.random.uniform(next(keys), (num_classes,), jnp.float32, -k, k)
    # padded (HP, CP): rows HID:HP and cols num_classes:CP are zero
    params["out_w"] = jnp.zeros((HP, CP), jnp.float32).at[
        :HID, :num_classes].set(out_w.T)
    params["out_b"] = jnp.zeros((1, CP), jnp.float32).at[
        0, :num_classes].set(out_b)
    return params


def init_hidden(key, batchsize):
    """Matches BiLSTM.init_hidden: xavier_uniform on (num_layers*2, B, H)."""
    fan_in = batchsize * HID
    fan_out = (NUM_LAYERS * 2) * HID
    bound = math.sqrt(6.0 / (fan_in + fan_out))
    ka, kb = jax.random.split(key)
    h0 = jax.random.uniform(ka, (NUM_LAYERS * 2, batchsize, HID),
                            jnp.float32, -bound, bound)
    c0 = jax.random.uniform(kb, (NUM_LAYERS * 2, batchsize, HID),
                            jnp.float32, -bound, bound)
    return h0, c0


# ---------------------------------------------------------------------------
# Full forward (embedding / dropout glue in JAX, hot loops in Pallas)
# ---------------------------------------------------------------------------
def bilstm_forward(params, input_ids, h0, c0, dropout_key, num_classes):
    B, T = input_ids.shape
    lens = (input_ids != PAD_ID).sum(axis=1).astype(jnp.int32)      # (B,)
    # time-major validity mask for the recurrence kernels
    tmask = (jnp.arange(T)[:, None] < lens[None, :]
             ).astype(jnp.float32)[..., None]                       # (T, B, 1)

    embeds = params["embed"][input_ids]                             # (B, T, E)
    x = jnp.transpose(embeds, (1, 0, 2)).astype(jnp.float32)        # (T, B, E)
    x = jnp.pad(x, ((0, 0), (0, 0), (0, EP - EMBED)))               # (T, B, EP)

    for l in range(NUM_LAYERS):
        wihT, whhT, bias = params["lstm"][l]
        dp = wihT.shape[1]
        # hoisted input projection: one big matmul per direction
        x2d = x.reshape(T * B, dp).astype(jnp.bfloat16)
        gx = input_proj(x2d, wihT, bias).reshape(2, T, B, 4 * HP)
        h0p = jnp.zeros((2, B, HP), jnp.float32).at[:, :, :HID].set(
            h0[2 * l:2 * l + 2])
        c0p = jnp.zeros((2, B, HP), jnp.float32).at[:, :, :HID].set(
            c0[2 * l:2 * l + 2])
        x = lstm_layer(gx, whhT, h0p, c0p, tmask)                   # (T,B,2HP)

    unpacked = jnp.transpose(x, (1, 0, 2))                          # (B,T,2HP)
    # pad_packed_sequence(padding_value=pad_id)
    valid = (jnp.arange(T)[None, :] < lens[:, None])[..., None]     # (B,T,1)
    unpacked = jnp.where(valid, unpacked, jnp.float32(PAD_ID))
    # sum forward + backward halves (padded lanes hit zero out_w rows)
    summed = unpacked[:, :, :HP] + unpacked[:, :, HP:]              # (B,T,HP)

    # F.dropout default: p=0.5, training=True (Bernoulli mask + 1/(1-p) scale).
    # RNG stream necessarily differs from torch's; semantics preserved.
    keep = jax.random.bernoulli(dropout_key, 0.5, summed.shape)
    dropped = jnp.where(keep, summed * 2.0, 0.0)

    flat = dropped.reshape(B * T, HP)
    logits = linear_pallas(flat, params["out_w"], params["out_b"])  # (B*T, CP)
    return logits[:, :num_classes].reshape(B, T, num_classes)


# ---------------------------------------------------------------------------
if __name__ == "__main__":
    B, T = 2, 8
    VOCAB = 8002          # bert_config['vocab_size']
    NUM_CLASSES = 5

    root = jax.random.PRNGKey(0)
    k_param, k_hidden, k_ids, k_drop = jax.random.split(root, 4)

    params = init_params(k_param, VOCAB, NUM_CLASSES)
    h0, c0 = init_hidden(k_hidden, B)          # evaluate_mode=False path

    # deterministic input ids with trailing padding (lengths 8 and 5)
    lens = jnp.array([8, 5], dtype=jnp.int32)
    ids = jax.random.randint(k_ids, (B, T), 2, VOCAB, dtype=jnp.int32)
    ids = jnp.where(jnp.arange(T)[None, :] < lens[:, None], ids, PAD_ID)

    out = bilstm_forward(params, ids, h0, c0, k_drop, NUM_CLASSES)
    jax.block_until_ready(out)
    assert out.shape == (B, T, NUM_CLASSES)
    print("KERNEL_OK")
</pallas_src>

<mosaic_0001>
module attributes {stable_mosaic.version = 11 : i64} {
  func.func @_in_proj_kernel(%arg0: i32, %arg1: memref<16x128xbf16, #tpu.memory_space<vmem>>, %arg2: memref<1x128x2048xbf16, #tpu.memory_space<vmem>>, %arg3: memref<1x1x2048xf32, #tpu.memory_space<vmem>>, %arg4: memref<1x16x2048xf32, #tpu.memory_space<vmem>>) attributes {dimension_semantics = [#tpu.dimension_semantics<parallel>], iteration_bounds = array<i64: 2>, scalar_prefetch = 0 : i64, scratch_operands = 0 : i64, tpu.core_type = #tpu.core_type<tc>, window_params = [{pipeline_mode = #tpu.pipeline_mode<synchronous>, transform_indices = @transform_0, window_bounds = array<i64: 16, 128>}, {transform_indices = @transform_1, window_bounds = array<i64: 1, 128, 2048>}, {transform_indices = @transform_2, window_bounds = array<i64: 1, 1, 2048>}, {transform_indices = @transform_3, window_bounds = array<i64: 1, 16, 2048>}]} {
    %c0 = arith.constant 0 : index
    %c0_0 = arith.constant 0 : index
    %0 = vector.load %arg1[%c0, %c0_0] : memref<16x128xbf16, #tpu.memory_space<vmem>>, vector<16x128xbf16>
    %c0_1 = arith.constant 0 : index
    %c0_2 = arith.constant 0 : index
    %c0_3 = arith.constant 0 : index
    %1 = vector.load %arg2[%c0_1, %c0_2, %c0_3] : memref<1x128x2048xbf16, #tpu.memory_space<vmem>>, vector<1x128x2048xbf16>
    %2 = vector.shape_cast %1 : vector<1x128x2048xbf16> to vector<128x2048xbf16>
    %cst = arith.constant dense<0.000000e+00> : vector<16x2048xf32>
    %3 = tpu.matmul %0, %2, %cst {dimension_numbers = #tpu.dot_dimension_numbers<[1], [0], [0], [1], [0, 0, 1, 1], [], []>} : vector<16x128xbf16>, vector<128x2048xbf16>, vector<16x2048xf32> -> vector<16x2048xf32>
    %c0_4 = arith.constant 0 : index
    %c0_5 = arith.constant 0 : index
    %c0_6 = arith.constant 0 : index
    %4 = vector.load %arg3[%c0_4, %c0_5, %c0_6] : memref<1x1x2048xf32, #tpu.memory_space<vmem>>, vector<1x1x2048xf32>
    %5 = vector.shape_cast %4 : vector<1x1x2048xf32> to vector<1x2048xf32>
    %6 = vector.broadcast %5 : vector<1x2048xf32> to vector<16x2048xf32>
    %7 = arith.addf %3, %6 : vector<16x2048xf32>
    %c0_7 = arith.constant 0 : index
    %c0_8 = arith.constant 0 : index
    %c0_9 = arith.constant 0 : index
    %8 = vector.load %arg4[%c0_7, %c0_8, %c0_9] : memref<1x16x2048xf32, #tpu.memory_space<vmem>>, vector<1x16x2048xf32>
    %9 = vector.shape_cast %8 : vector<1x16x2048xf32> to vector<16x2048xf32>
    %10 = vector.shape_cast %7 : vector<16x2048xf32> to vector<1x16x2048xf32>
    tpu.vector_store %arg4[%c0_7, %c0_8, %c0_9], %10 {strides = array<i32>} : memref<1x16x2048xf32, #tpu.memory_space<vmem>>, vector<1x16x2048xf32>,
    return
  }
  func.func @transform_0(%arg0: i32) -> (i32, i32) {
    %c0_i32 = arith.constant 0 : i32
    %c0_i32_0 = arith.constant 0 : i32
    %c0_i32_1 = arith.constant 0 : i32
    return %c0_i32, %c0_i32_0 : i32, i32
  }
  func.func @transform_1(%arg0: i32) -> (i32, i32, i32) {
    %c0_i32 = arith.constant 0 : i32
    %c0_i32_0 = arith.constant 0 : i32
    %c0_i32_1 = arith.constant 0 : i32
    return %arg0, %c0_i32, %c0_i32_0 : i32, i32, i32
  }
  func.func @transform_2(%arg0: i32) -> (i32, i32, i32) {
    %c0_i32 = arith.constant 0 : i32
    %c0_i32_0 = arith.constant 0 : i32
    %c0_i32_1 = arith.constant 0 : i32
    return %arg0, %c0_i32, %c0_i32_0 : i32, i32, i32
  }
  func.func @transform_3(%arg0: i32) -> (i32, i32, i32) {
    %c0_i32 = arith.constant 0 : i32
    %c0_i32_0 = arith.constant 0 : i32
    %c0_i32_1 = arith.constant 0 : i32
    return %arg0, %c0_i32, %c0_i32_0 : i32, i32, i32
  }
}

</mosaic_0001>

<bundles_post_ra>
// kernel: tpu_custom_call.1
= control target key start
LH: loop header
LB: loop body
LE: loop exit
PB: predicated region body
PF: predicated region fallthrough
CT: control target
= control target key end

     0   :  { %s2843_s0 = inlined_call_operand.hbm [shape: bf16[16,128], index: 0, kind: input, shape index: {}]   ;;  %s2844_s1 = inlined_call_operand.hbm [shape: bf16[2,128,2048], index: 1, kind: input, shape index: {}]   ;;  %s2845_s2 = inlined_call_operand.hbm [shape: f32[2,1,2048], index: 2, kind: input, shape index: {}]   ;;  %s2846_s3 = inlined_call_operand.hbm [shape: f32[2,16,2048], index: 3, kind: output, shape index: {}]  }
   0x1   :  { %2847 = sst [smem:[#allocation12_spill]] %s2843_s0 }
   0x2   :  { %8 = vsyncpa [#allocation3], 0 }
   0x3   :  { %9 = vsyncpa [#allocation6], 0 }
   0x4   :  { %11 = vsyncpa [#allocation6 + $0x1], 0 }
   0x5   :  { %12 = vsyncpa [#allocation4], 0 }
   0x6   :  { %14 = vsyncpa [#allocation4 + $0x1], 0  ;;  %s2354_s12 = smov 0   ;;  %s2356_s13 = smov 0  }
   0x7   :  { %s2358_s14 = smov 0   ;;  %s2360_s15 = smov 0  }
   0x8 LB: > { %s2375_s16 = sadd.s32 1, %s2326_s15   ;;  %s48_s17 = sadd.s32 1, %s2322_s14  ;;  %s2326_s15 = sphi %s2360_s15, %s2858_s15   ;;  %s2322_s14 = sphi %s2358_s14, %s2857_s14   ;;  %s2318_s13 = sphi %s2356_s13, %s2856_s13   ;;  %s2314_s12 = sphi %s2354_s12, %s2855_s12  }
   0x9   : > { %s45_s18 = ssub.s32 %s2326_s15, %s2375_s16  ;;  %p55_p0 = scmp.ne.s32.totalorder %s2322_s14, %s2318_s13 }
   0xa   : > { %p46_p1 = scmp.eq.s32.totalorder %s45_s18, 0  ;;  %p56_p2 = scmp.eq.s32.totalorder %s2326_s15, 0 }
   0xb   : > { %p2125_p5 = scmp.lt.s32.totalorder %s2326_s15, 2  ;;  %s151_s20 = sand.u32 1, %s2326_s15  }
   0xc   : > { %s2385_s19 = scalar_select %p46_p1, %s2322_s14, %s48_s17  }
   0xd   : > { %p57_p4 = por %p56_p2, %p55_p0  ;;  %s153_s21 = sand.u32 1, %s2322_s14  }
   0xe   : > { %s1437_s22 = sshll.u32 %s153_s21, 10  ;;  %s1968_s23 = sshll.u32 %s2326_s15, 10 }
   0xf   : > { %s160_s26 = scalar_lea.hbm %s2844_s1, %s1968_s23  ;;  %s155_s27 = scalar_lea.vmem [#allocation5], %s1437_s22 }
  0x10   : > { %s163_s28 = sshll.u32 %s155_s27, 4  ;;  %s161_s29 = sshll.u32 %s160_s26, 4  ;;  %s164_s28 = int_to_ptr.vmem [resolvable:$true] %s163_s28  ;;  %s162_s29 = int_to_ptr.hbm [resolvable:$true] %s161_s29 }
  0x11   : > { %p2399_p6 = pnand %p2125_p5, %p57_p4  ;;  %s2403_s4 = scalar_lea.sflag [#allocation6], %s151_s20 }
  0x12   : > { %s2166_s5 = sshra.s32 %s162_s29, 4  ;;  %s2173_s9 = scalar_lea.hbm %s2844_s1, 2048  ;;  %s2167_s5 = int_to_ptr.hbm [resolvable:$true] %s2166_s5 }
  0x13   : > { %s2168_s6 = scalar_lea.hbm %s2167_s5, 1024  ;;  %p2170_p8 = pneg %p2399_p6 }
  0x14   : > { %p2169_p7 = scmp.ne.s32.totalorder %s2167_s5, %s2168_s6  ;;  %p2174_p11 = scmp.lt.s32.totalorder %s2167_s5, %s2844_s1 }
  0x15   : > { %p2175_p12 = scmp.lt.s32.totalorder %s2173_s9, %s2168_s6 }
  0x16   : > { %p2171_p9 = pnand %p2170_p8, %p2169_p7 }
  0x17   : > { %p2176_p13 = por %p2175_p12, %p2174_p11 }
  0x18   : > { %p2172_p10 = pneg %p2171_p9 }
  0x1a   : > { %p2177_p1 = pnand %p2176_p13, %p2172_p10 }
  0x1c   : > { %2180 = shalt.err (!%p2177_p1)
}
  0x1d   : > { %s2328_s17 = smov 1024   ;;  %s2329_s18 = smov 64  }
  0x1e   : > { %2116 = dma.hbm_to_vmem [thread:$0]  (!%p2399_p6), %s162_s29, 16384, %s164_s28, %s2403_s4, %s2328_s17, %s2328_s17, %s2329_s18  }
  0x1f   : > { %s2421_s20 = sadd.s32 4294967295, %s2326_s15   ;;  %s1433_s22 = sadd.s32 4294967294, %s2326_s15  }
  0x20   : > { %p61_p2 = scmp.ne.s32.totalorder %s2318_s13, %s2314_s12  ;;  %p62_p4 = scmp.eq.s32.totalorder %s2421_s20, 0 }
  0x21   : > { %p111_p5 = scmp.eq.s32.totalorder %s2421_s20, 1  ;;  %p117_p7 = scmp.eq.s32.totalorder %s1433_s22, 1 }
  0x22   : > { %p2430_p9 = por %p62_p4, %p61_p2  ;;  %p1434_p10 = scmp.ge.s32.totalorder %s2326_s15, 1 }
  0x23   : > { %p2438_p11 = por %p111_p5, %p55_p0  ;;  %p2442_p12 = por %p117_p7, %p61_p2 }
  0x24   : > { %p124_p13 = scmp.lt.s32.totalorder %s2326_s15, 3  ;;  %s2852_s0 = sld [smem:[#allocation12_spill]] }
  0x25   : > { %s2330_s5 = smov [#allocation2]   ;;  %s1440_s7 = sshll.u32 %s153_s21, 4 }
  0x26   : > { %p2450_p1 = pnand %p1434_p10, %p124_p13  ;;  %s137_s6 = sshll.u32 %s2330_s5, 4  ;;  %s138_s6 = int_to_ptr.vmem [resolvable:$true] %s137_s6 }
  0x27   : > { %s1441_s8 = sshll.u32 %s2326_s15, 4  ;;  %s177_s17 = scalar_lea.vmem [#allocation7], %s1440_s7 }
  0x28   : > { %p2109_p0 = pneg %p2450_p1  ;;  %s181_s11 = scalar_lea.hbm %s2845_s2, %s1441_s8 }
  0x29   : > { %s185_s22 = sshll.u32 %s177_s17, 4  ;;  %s183_s26 = sshll.u32 %s181_s11, 4  ;;  %s184_s26 = int_to_ptr.hbm [resolvable:$true] %s183_s26  ;;  %s186_s22 = int_to_ptr.vmem [resolvable:$true] %s185_s22 }
  0x2a   : > { %s135_s28 = sshll.u32 %s2852_s0, 4  ;;  %p2110_p2 = pnand %p2109_p0, %p62_p4  ;;  %s136_s28 = int_to_ptr.hbm [resolvable:$true] %s135_s28 }
  0x2b   : > { %s2331_s27 = smov 4   ;;  %s2226_s5 = sshra.s32 %s184_s26, 4  ;;  %s2227_s5 = int_to_ptr.hbm [resolvable:$true] %s2226_s5 }
  0x2c   : > { %2112 = dma.hbm_to_vmem [thread:$0]  (!%p2110_p2), %s136_s28, 128, %s138_s6, [#allocation3], %s2329_s18, %s2329_s18, %s2331_s27  }
  0x2d   : > { %s2228_s0 = scalar_lea.hbm %s2227_s5, 16  ;;  %s2233_s7 = scalar_lea.hbm %s2845_s2, 32 }
  0x2e   : > { %p2229_p5 = scmp.ne.s32.totalorder %s2227_s5, %s2228_s0  ;;  %p2234_p13 = scmp.lt.s32.totalorder %s2227_s5, %s2845_s2 }
  0x2f   : > { %p2235_p0 = scmp.lt.s32.totalorder %s2233_s7, %s2228_s0 }
  0x30   : > { %p2231_p7 = pnand %p2229_p5, %p2170_p8 }
  0x31   : > { %p2236_p2 = por %p2235_p0, %p2234_p13 }
  0x32   : > { %p2232_p10 = pneg %p2231_p7 }
  0x34   : > { %p2237_p3 = pnand %p2236_p2, %p2232_p10 }
  0x36   : > { %2240 = shalt.err (!%p2237_p3)
}
  0x37   : > { %2119 = dma.hbm_to_vmem [thread:$0]  (!%p2399_p6), %s184_s26, 256, %s186_s22, %s2403_s4  }
  0x38   : > { %194 = sbr.rel (%p2450_p1) target bundleno = 345 (0x159), region = 32 }
  0x3d   : > { %2301 = dma.done.wait (%p62_p4), [#allocation3], 128  }
  0x3e   : > { %2303 = vsyncadd (%p62_p4), [#allocation3], 4294967168  ;;  %s201_s0 = sand.u32 1, %s2421_s20   ;;  %s2486_s18 = sand.u32 1, %s2318_s13  }
  0x3f   : > { %s1444_s28 = sshll.u32 %s2486_s18, 10  ;;  %s202_s30 = scalar_lea.sflag [#allocation6], %s201_s0 }
  0x40   : > { %s2489_s6 = scalar_lea.vmem [#allocation5], %s1444_s28 }
  0x41   : > { %2305 = dma.done.wait (%p2430_p9), %s202_s30, 16640  }
  0x42   : > { %2307 = vsyncadd (%p2430_p9), %s202_s30, 4294950656  ;;  %v1901_v0 = vld [vmem:[%s2489_s6 + $0x380] sm:$0xf]  ;;  %v2082_v2 = vld [vmem:[%s2489_s6 + $0x384] sm:$0xf]  ;;  %s1445_s4 = sshll.u32 %s2486_s18, 4 }
  0x43   : > { %v2090_v1 = vld [vmem:[%s2489_s6 + $0x3bc] sm:$0xf0]  ;;  %v1903_v4 = vld [vmem:[%s2489_s6 + $0x3c0] sm:$0xf0]  ;;  %v1909_v5 = vld [vmem:[%s2489_s6 + $0x388] sm:$0xf] }
  0x44   : > { %v1902_v3 = vor.u32 %v2090_v1, %v1901_v0  ;;  %v2091_v6 = vld [vmem:[%s2489_s6 + $0x3c4] sm:$0xf0]  ;;  %v1906_v7 = vor.u32 %v2082_v2, %v1903_v4  ;;  %v2083_v9 = vld [vmem:[%s2489_s6 + $0x38c] sm:$0xf]  ;;  %v1837_v11 = vld [vmem:[%s2489_s6 + $0x300] sm:$0xf] }
  0x45   : > { %v1910_v8 = vor.u32 %v2091_v6, %v1909_v5  ;;  %v1911_v10 = vld [vmem:[%s2489_s6 + $0x3c8] sm:$0xf0]  ;;  %v2074_v13 = vld [vmem:[%s2489_s6 + $0x33c] sm:$0xf0]  ;;  %v2066_v14 = vld [vmem:[%s2489_s6 + $0x304] sm:$0xf] }
  0x46   : > { %1056 = vmatpush.bf16.msra.mxu0 %v1902_v3  ;;  %v1914_v12 = vor.u32 %v2083_v9, %v1911_v10  ;;  %v1839_v15 = vld [vmem:[%s2489_s6 + $0x340] sm:$0xf0]  ;;  %1070 = vmatpush.bf16.msra.mxu1 %v1906_v7  ;;  %v1838_v16 = vor.u32 %v2074_v13, %v1837_v11  ;;  %v1845_v18 = vld [vmem:[%s2489_s6 + $0x308] sm:$0xf]  ;;  %v2067_v20 = vld [vmem:[%s2489_s6 + $0x30c] sm:$0xf] }
  0x47   : > { %1084 = vmatpush.bf16.msra.mxu2 %v1910_v8  ;;  %v1842_v17 = vor.u32 %v2066_v14, %v1839_v15  ;;  %v2075_v19 = vld [vmem:[%s2489_s6 + $0x344] sm:$0xf0]  ;;  %v1847_v22 = vld [vmem:[%s2489_s6 + $0x348] sm:$0xf0]  ;;  %v1773_v23 = vld [vmem:[%s2489_s6 + $0x280] sm:$0xf] }
  0x48   : > { %1098 = vmatpush.bf16.msra.mxu3 %v1914_v12  ;;  %v1846_v21 = vor.u32 %v2075_v19, %v1845_v18  ;;  %v2058_v24 = vld [vmem:[%s2489_s6 + $0x2bc] sm:$0xf0]  ;;  %v1850_v25 = vor.u32 %v2067_v20, %v1847_v22  ;;  %v2050_v26 = vld [vmem:[%s2489_s6 + $0x284] sm:$0xf]  ;;  %v1781_v28 = vld [vmem:[%s2489_s6 + $0x288] sm:$0xf] }
  0x49   : > { %v1775_v27 = vld [vmem:[%s2489_s6 + $0x2c0] sm:$0xf0]  ;;  %v1774_v29 = vor.u32 %v2058_v24, %v1773_v23  ;;  %v2059_v30 = vld [vmem:[%s2489_s6 + $0x2c4] sm:$0xf0]  ;;  %v2051_v31 = vld [vmem:[%s2489_s6 + $0x28c] sm:$0xf] }
  0x4a   : > { %1057 = vmatpush.bf16.msra.mxu0 %v1838_v16  ;;  %v1783_v32 = vld [vmem:[%s2489_s6 + $0x2c8] sm:$0xf0]  ;;  %1071 = vmatpush.bf16.msra.mxu1 %v1842_v17  ;;  %v1778_v33 = vor.u32 %v2050_v26, %v1775_v27  ;;  %v1782_v34 = vor.u32 %v2059_v30, %v1781_v28  ;;  %v1709_v35 = vld [vmem:[%s2489_s6 + $0x200] sm:$0xf]  ;;  %v2034_v37 = vld [vmem:[%s2489_s6 + $0x204] sm:$0xf] }
  0x4b   : > { %1085 = vmatpush.bf16.msra.mxu2 %v1846_v21  ;;  %v2042_v36 = vld [vmem:[%s2489_s6 + $0x23c] sm:$0xf0]  ;;  %v1786_v38 = vor.u32 %v2051_v31, %v1783_v32  ;;  %v1711_v39 = vld [vmem:[%s2489_s6 + $0x240] sm:$0xf0]  ;;  %v1717_v40 = vld [vmem:[%s2489_s6 + $0x208] sm:$0xf] }
  0x4c   : > { %1099 = vmatpush.bf16.msra.mxu3 %v1850_v25  ;;  %v2043_v41 = vld [vmem:[%s2489_s6 + $0x244] sm:$0xf0]  ;;  %v2035_v42 = vld [vmem:[%s2489_s6 + $0x20c] sm:$0xf]  ;;  %v1710_v44 = vor.u32 %v2042_v36, %v1709_v35  ;;  %v1714_v45 = vor.u32 %v2034_v37, %v1711_v39  ;;  %v1645_v47 = vld [vmem:[%s2489_s6 + $0x180] sm:$0xf] }
  0x4d   : > { %v1719_v43 = vld [vmem:[%s2489_s6 + $0x248] sm:$0xf0]  ;;  %v1718_v46 = vor.u32 %v2043_v41, %v1717_v40  ;;  %v2026_v48 = vld [vmem:[%s2489_s6 + $0x1bc] sm:$0xf0]  ;;  %v2018_v49 = vld [vmem:[%s2489_s6 + $0x184] sm:$0xf] }
  0x4e   : > { %1058 = vmatpush.bf16.msra.mxu0 %v1774_v29  ;;  %1072 = vmatpush.bf16.msra.mxu1 %v1778_v33  ;;  %v1722_v50 = vor.u32 %v2035_v42, %v1719_v43  ;;  %v1647_v51 = vld [vmem:[%s2489_s6 + $0x1c0] sm:$0xf0]  ;;  %v1653_v52 = vld [vmem:[%s2489_s6 + $0x188] sm:$0xf]  ;;  %v2019_v54 = vld [vmem:[%s2489_s6 + $0x18c] sm:$0xf]  ;;  %v1646_v56 = vor.u32 %v2026_v48, %v1645_v47 }
  0x4f   : > { %1086 = vmatpush.bf16.msra.mxu2 %v1782_v34  ;;  %v2027_v53 = vld [vmem:[%s2489_s6 + $0x1c4] sm:$0xf0]  ;;  %v1655_v55 = vld [vmem:[%s2489_s6 + $0x1c8] sm:$0xf0]  ;;  %v1650_v57 = vor.u32 %v2018_v49, %v1647_v51  ;;  %v1581_v59 = vld [vmem:[%s2489_s6 + $0x100] sm:$0xf] }
  0x50   : > { %1100 = vmatpush.bf16.msra.mxu3 %v1786_v38  ;;  %v1654_v58 = vor.u32 %v2027_v53, %v1653_v52  ;;  %v2010_v60 = vld [vmem:[%s2489_s6 + $0x13c] sm:$0xf0]  ;;  %v2002_v61 = vld [vmem:[%s2489_s6 + $0x104] sm:$0xf]  ;;  %v1658_v62 = vor.u32 %v2019_v54, %v1655_v55  ;;  %v1589_v0 = vld [vmem:[%s2489_s6 + $0x108] sm:$0xf] }
  0x51   : > { %v1583_v63 = vld [vmem:[%s2489_s6 + $0x140] sm:$0xf0]  ;;  %v2011_v1 = vld [vmem:[%s2489_s6 + $0x144] sm:$0xf0]  ;;  %v2003_v2 = vld [vmem:[%s2489_s6 + $0x10c] sm:$0xf]  ;;  %v1582_v4 = vor.u32 %v2010_v60, %v1581_v59 }
  0x52   : > { %1059 = vmatpush.bf16.msra.mxu0 %v1710_v44  ;;  %1073 = vmatpush.bf16.msra.mxu1 %v1714_v45  ;;  %v1591_v3 = vld [vmem:[%s2489_s6 + $0x148] sm:$0xf0]  ;;  %v1586_v5 = vor.u32 %v2002_v61, %v1583_v63  ;;  %v1590_v6 = vor.u32 %v2011_v1, %v1589_v0  ;;  %v1517_v7 = vld [vmem:[%s2489_s6 + $0x80] sm:$0xf]  ;;  %v1986_v9 = vld [vmem:[%s2489_s6 + $0x84] sm:$0xf] }
  0x53   : > { %1087 = vmatpush.bf16.msra.mxu2 %v1718_v46  ;;  %v1994_v8 = vld [vmem:[%s2489_s6 + $0xbc] sm:$0xf0]  ;;  %v1594_v10 = vor.u32 %v2003_v2, %v1591_v3  ;;  %v1519_v11 = vld [vmem:[%s2489_s6 + $0xc0] sm:$0xf0]  ;;  %v1525_v12 = vld [vmem:[%s2489_s6 + $0x88] sm:$0xf] }
  0x54   : > { %1101 = vmatpush.bf16.msra.mxu3 %v1722_v50  ;;  %v1995_v13 = vld [vmem:[%s2489_s6 + $0xc4] sm:$0xf0]  ;;  %v1987_v14 = vld [vmem:[%s2489_s6 + $0x8c] sm:$0xf]  ;;  %v1518_v16 = vor.u32 %v1994_v8, %v1517_v7  ;;  %v1453_v17 = vld [vmem:[%s2489_s6] sm:$0xf]  ;;  %v1522_v19 = vor.u32 %v1986_v9, %v1519_v11 }
  0x55   : > { %v1527_v15 = vld [vmem:[%s2489_s6 + $0xc8] sm:$0xf0]  ;;  %v1978_v18 = vld [vmem:[%s2489_s6 + $0x3c] sm:$0xf0]  ;;  %v1526_v20 = vor.u32 %v1995_v13, %v1525_v12  ;;  %v1970_v21 = vld [vmem:[%s2489_s6 + $0x4] sm:$0xf] }
  0x56   : > { %1060 = vmatpush.bf16.msra.mxu0 %v1646_v56  ;;  %1074 = vmatpush.bf16.msra.mxu1 %v1650_v57  ;;  %v1455_v22 = vld [vmem:[%s2489_s6 + $0x40] sm:$0xf0]  ;;  %v1461_v23 = vld [vmem:[%s2489_s6 + $0x8] sm:$0xf]  ;;  %v1530_v24 = vor.u32 %v1987_v14, %v1527_v15  ;;  %v1971_v26 = vld [vmem:[%s2489_s6 + $0xc] sm:$0xf]  ;;  %v1454_v31 = vor.u32 %v1978_v18, %v1453_v17 }
  0x57   : > { %1088 = vmatpush.bf16.msra.mxu2 %v1654_v58  ;;  %v1979_v25 = vld [vmem:[%s2489_s6 + $0x44] sm:$0xf0]  ;;  %v1463_v27 = vld [vmem:[%s2489_s6 + $0x48] sm:$0xf0]  ;;  %v1917_v28 = vld [vmem:[%s2489_s6 + $0x390] sm:$0xf]  ;;  %v1458_v35 = vor.u32 %v1970_v21, %v1455_v22 }
  0x58   : > { %1102 = vmatpush.bf16.msra.mxu3 %v1658_v62  ;;  %v2092_v29 = vld [vmem:[%s2489_s6 + $0x3cc] sm:$0xf0]  ;;  %v2084_v30 = vld [vmem:[%s2489_s6 + $0x394] sm:$0xf]  ;;  %v1925_v33 = vld [vmem:[%s2489_s6 + $0x398] sm:$0xf]  ;;  %v1462_v36 = vor.u32 %v1979_v25, %v1461_v23  ;;  %v1466_v39 = vor.u32 %v1971_v26, %v1463_v27 }
  0x59   : > { %v1919_v32 = vld [vmem:[%s2489_s6 + $0x3d0] sm:$0xf0]  ;;  %v2093_v34 = vld [vmem:[%s2489_s6 + $0x3d4] sm:$0xf0]  ;;  %v2085_v37 = vld [vmem:[%s2489_s6 + $0x39c] sm:$0xf]  ;;  %v1918_v40 = vor.u32 %v2092_v29, %v1917_v28 }
  0x5a   : > { %1061 = vmatpush.bf16.msra.mxu0 %v1582_v4  ;;  %1075 = vmatpush.bf16.msra.mxu1 %v1586_v5  ;;  %v1927_v38 = vld [vmem:[%s2489_s6 + $0x3d8] sm:$0xf0]  ;;  %v1922_v41 = vor.u32 %v2084_v30, %v1919_v32  ;;  %v1926_v42 = vor.u32 %v2093_v34, %v1925_v33  ;;  %v1853_v43 = vld [vmem:[%s2489_s6 + $0x310] sm:$0xf]  ;;  %v2068_v45 = vld [vmem:[%s2489_s6 + $0x314] sm:$0xf] }
  0x5b   : > { %1089 = vmatpush.bf16.msra.mxu2 %v1590_v6  ;;  %v2076_v44 = vld [vmem:[%s2489_s6 + $0x34c] sm:$0xf0]  ;;  %v1930_v46 = vor.u32 %v2085_v37, %v1927_v38  ;;  %v1855_v47 = vld [vmem:[%s2489_s6 + $0x350] sm:$0xf0]  ;;  %v1861_v48 = vld [vmem:[%s2489_s6 + $0x318] sm:$0xf] }
  0x5c   : > { %1103 = vmatpush.bf16.msra.mxu3 %v1594_v10  ;;  %v2077_v49 = vld [vmem:[%s2489_s6 + $0x354] sm:$0xf0]  ;;  %v2069_v50 = vld [vmem:[%s2489_s6 + $0x31c] sm:$0xf]  ;;  %v1854_v52 = vor.u32 %v2076_v44, %v1853_v43  ;;  %v1858_v53 = vor.u32 %v2068_v45, %v1855_v47  ;;  %v1789_v55 = vld [vmem:[%s2489_s6 + $0x290] sm:$0xf] }
  0x5d   : > { %v1863_v51 = vld [vmem:[%s2489_s6 + $0x358] sm:$0xf0]  ;;  %v1862_v54 = vor.u32 %v2077_v49, %v1861_v48  ;;  %v2060_v56 = vld [vmem:[%s2489_s6 + $0x2cc] sm:$0xf0]  ;;  %v2052_v57 = vld [vmem:[%s2489_s6 + $0x294] sm:$0xf] }
  0x5e   : > { %1062 = vmatpush.bf16.msra.mxu0 %v1518_v16  ;;  %1076 = vmatpush.bf16.msra.mxu1 %v1522_v19  ;;  %v1866_v58 = vor.u32 %v2069_v50, %v1863_v51  ;;  %v1791_v59 = vld [vmem:[%s2489_s6 + $0x2d0] sm:$0xf0]  ;;  %v1797_v60 = vld [vmem:[%s2489_s6 + $0x298] sm:$0xf]  ;;  %v2053_v62 = vld [vmem:[%s2489_s6 + $0x29c] sm:$0xf]  ;;  %v1790_v0 = vor.u32 %v2060_v56, %v1789_v55 }
  0x5f   : > { %1090 = vmatpush.bf16.msra.mxu2 %v1526_v20  ;;  %v2061_v61 = vld [vmem:[%s2489_s6 + $0x2d4] sm:$0xf0]  ;;  %v1799_v63 = vld [vmem:[%s2489_s6 + $0x2d8] sm:$0xf0]  ;;  %v1794_v2 = vor.u32 %v2052_v57, %v1791_v59  ;;  %v1725_v4 = vld [vmem:[%s2489_s6 + $0x210] sm:$0xf] }
  0x60   : > { %1104 = vmatpush.bf16.msra.mxu3 %v1530_v24  ;;  %v2583_v1 = vld [vmem:[#allocation2] sm:$0xff]  ;;  %v1798_v3 = vor.u32 %v2061_v61, %v1797_v60  ;;  %v2044_v5 = vld [vmem:[%s2489_s6 + $0x24c] sm:$0xf0]  ;;  %v2036_v6 = vld [vmem:[%s2489_s6 + $0x214] sm:$0xf]  ;;  %v1802_v7 = vor.u32 %v2053_v62, %v1799_v63  ;;  %s2770_s23 = scalar_lea.vmem [#allocation7], %s1445_s4 }
  0x61   : > { %v1727_v8 = vld [vmem:[%s2489_s6 + $0x250] sm:$0xf0]  ;;  %v1733_v9 = vld [vmem:[%s2489_s6 + $0x218] sm:$0xf]  ;;  %v2037_v11 = vld [vmem:[%s2489_s6 + $0x21c] sm:$0xf]  ;;  %v1726_v13 = vor.u32 %v2044_v5, %v1725_v4 }
  0x62   : > { %1063 = vmatpush.bf16.msra.mxu0 %v1454_v31  ;;  %1077 = vmatpush.bf16.msra.mxu1 %v1458_v35  ;;  %v2045_v10 = vld [vmem:[%s2489_s6 + $0x254] sm:$0xf0]  ;;  %v1735_v12 = vld [vmem:[%s2489_s6 + $0x258] sm:$0xf0]  ;;  %v1730_v14 = vor.u32 %v2036_v6, %v1727_v8  ;;  %v1661_v16 = vld [vmem:[%s2489_s6 + $0x190] sm:$0xf] }
  0x63   : > { %1091 = vmatpush.bf16.msra.mxu2 %v1462_v36  ;;  %v1734_v15 = vor.u32 %v2045_v10, %v1733_v9  ;;  %v2028_v17 = vld [vmem:[%s2489_s6 + $0x1cc] sm:$0xf0]  ;;  %v2020_v18 = vld [vmem:[%s2489_s6 + $0x194] sm:$0xf]  ;;  %v1738_v19 = vor.u32 %v2037_v11, %v1735_v12  ;;  %v1669_v21 = vld [vmem:[%s2489_s6 + $0x198] sm:$0xf] }
  0x64   : > { %1105 = vmatpush.bf16.msra.mxu3 %v1466_v39  ;;  %v1663_v20 = vld [vmem:[%s2489_s6 + $0x1d0] sm:$0xf0]  ;;  %v2029_v22 = vld [vmem:[%s2489_s6 + $0x1d4] sm:$0xf0]  ;;  %v2021_v23 = vld [vmem:[%s2489_s6 + $0x19c] sm:$0xf]  ;;  %v1662_v25 = vor.u32 %v2028_v17, %v1661_v16 }
  0x65   : > { %1064 = vmatmul.bf16.vlgmr.msra.gmra.mxu0 %v2583_v1  ;;  %1078 = vmatmul.bf16.vlgmr.msra.gmra.mxu1 %v2583_v1  ;;  %v1671_v24 = vld [vmem:[%s2489_s6 + $0x1d8] sm:$0xf0]  ;;  %v1666_v26 = vor.u32 %v2020_v18, %v1663_v20  ;;  %v1670_v27 = vor.u32 %v2029_v22, %v1669_v21  ;;  %v1597_v28 = vld [vmem:[%s2489_s6 + $0x110] sm:$0xf]  ;;  %v2004_v30 = vld [vmem:[%s2489_s6 + $0x114] sm:$0xf] }
  0x66   : > { %1112 = vmatpush.bf16.msrb.mxu0 %v1918_v40  ;;  %1126 = vmatpush.bf16.msrb.mxu1 %v1922_v41  ;;  %v2012_v29 = vld [vmem:[%s2489_s6 + $0x14c] sm:$0xf0]  ;;  %v1674_v31 = vor.u32 %v2021_v23, %v1671_v24  ;;  %v1599_v32 = vld [vmem:[%s2489_s6 + $0x150] sm:$0xf0]  ;;  %v1605_v33 = vld [vmem:[%s2489_s6 + $0x118] sm:$0xf] }
  0x67   : > { %1140 = vmatpush.bf16.msrb.mxu2 %v1926_v42  ;;  %1106 = vmatmul.bf16.vlgmr.msra.gmra.mxu3 %v2583_v1  ;;  %v2013_v34 = vld [vmem:[%s2489_s6 + $0x154] sm:$0xf0]  ;;  %v2005_v35 = vld [vmem:[%s2489_s6 + $0x11c] sm:$0xf]  ;;  %v1598_v37 = vor.u32 %v2012_v29, %v1597_v28  ;;  %v1602_v38 = vor.u32 %v2004_v30, %v1599_v32  ;;  %v1533_v40 = vld [vmem:[%s2489_s6 + $0x90] sm:$0xf] }
  0x68   : > { %1154 = vmatpush.bf16.msrb.mxu3 %v1930_v46  ;;  %1092 = vmatmul.bf16.vlgmr.msra.gmra.mxu2 %v2583_v1  ;;  %v1607_v36 = vld [vmem:[%s2489_s6 + $0x158] sm:$0xf0]  ;;  %v1606_v39 = vor.u32 %v2013_v34, %v1605_v33  ;;  %v1996_v41 = vld [vmem:[%s2489_s6 + $0xcc] sm:$0xf0]  ;;  %v1988_v42 = vld [vmem:[%s2489_s6 + $0x94] sm:$0xf] }
  0x69   : > { %v1610_v43 = vor.u32 %v2005_v35, %v1607_v36  ;;  %v1535_v44 = vld [vmem:[%s2489_s6 + $0xd0] sm:$0xf0]  ;;  %v1541_v45 = vld [vmem:[%s2489_s6 + $0x98] sm:$0xf]  ;;  %v1989_v47 = vld [vmem:[%s2489_s6 + $0x9c] sm:$0xf]  ;;  %v1534_v49 = vor.u32 %v1996_v41, %v1533_v40 }
  0x6a   : > { %1113 = vmatpush.bf16.msrb.mxu0 %v1854_v52  ;;  %1127 = vmatpush.bf16.msrb.mxu1 %v1858_v53  ;;  %v1997_v46 = vld [vmem:[%s2489_s6 + $0xd4] sm:$0xf0]  ;;  %v1543_v48 = vld [vmem:[%s2489_s6 + $0xd8] sm:$0xf0]  ;;  %v1469_v50 = vld [vmem:[%s2489_s6 + $0x10] sm:$0xf]  ;;  %v1538_v52 = vor.u32 %v1988_v42, %v1535_v44 }
  0x6b   : > { %1141 = vmatpush.bf16.msrb.mxu2 %v1862_v54  ;;  %v1980_v51 = vld [vmem:[%s2489_s6 + $0x4c] sm:$0xf0]  ;;  %v1542_v53 = vor.u32 %v1997_v46, %v1541_v45  ;;  %v1972_v54 = vld [vmem:[%s2489_s6 + $0x14] sm:$0xf]  ;;  %v1477_v56 = vld [vmem:[%s2489_s6 + $0x18] sm:$0xf]  ;;  %v1546_v57 = vor.u32 %v1989_v47, %v1543_v48 }
  0x6c   : > { %1155 = vmatpush.bf16.msrb.mxu3 %v1866_v58  ;;  %v1471_v55 = vld [vmem:[%s2489_s6 + $0x50] sm:$0xf0]  ;;  %v1981_v58 = vld [vmem:[%s2489_s6 + $0x54] sm:$0xf0]  ;;  %v1973_v59 = vld [vmem:[%s2489_s6 + $0x1c] sm:$0xf] }
  0x6d   : > { %v1479_v60 = vld [vmem:[%s2489_s6 + $0x58] sm:$0xf0]  ;;  %v1933_v61 = vld [vmem:[%s2489_s6 + $0x3a0] sm:$0xf]  ;;  %v2086_v63 = vld [vmem:[%s2489_s6 + $0x3a4] sm:$0xf]  ;;  %v1474_v5 = vor.u32 %v1972_v54, %v1471_v55  ;;  %v1478_v6 = vor.u32 %v1981_v58, %v1477_v56 }
  0x6e   : > { %1114 = vmatpush.bf16.msrb.mxu0 %v1790_v0  ;;  %1128 = vmatpush.bf16.msrb.mxu1 %v1794_v2  ;;  %v2094_v62 = vld [vmem:[%s2489_s6 + $0x3dc] sm:$0xf0]  ;;  %v1470_v0 = vor.u32 %v1980_v51, %v1469_v50  ;;  %v1935_v2 = vld [vmem:[%s2489_s6 + $0x3e0] sm:$0xf0]  ;;  %v2095_v4 = vld [vmem:[%s2489_s6 + $0x3e4] sm:$0xf0]  ;;  %v1482_v9 = vor.u32 %v1973_v59, %v1479_v60 }
  0x6f   : > { %1142 = vmatpush.bf16.msrb.mxu2 %v1798_v3  ;;  %v1941_v3 = vld [vmem:[%s2489_s6 + $0x3a8] sm:$0xf]  ;;  %v1943_v8 = vld [vmem:[%s2489_s6 + $0x3e8] sm:$0xf0]  ;;  %v1934_v10 = vor.u32 %v2094_v62, %v1933_v61  ;;  %v1938_v11 = vor.u32 %v2086_v63, %v1935_v2  ;;  %v1871_v17 = vld [vmem:[%s2489_s6 + $0x360] sm:$0xf0] }
  0x70   : > { %1156 = vmatpush.bf16.msrb.mxu3 %v1802_v7  ;;  %v2087_v7 = vld [vmem:[%s2489_s6 + $0x3ac] sm:$0xf]  ;;  %v1942_v12 = vor.u32 %v2095_v4, %v1941_v3  ;;  %v1877_v18 = vld [vmem:[%s2489_s6 + $0x328] sm:$0xf]  ;;  %v1807_v29 = vld [vmem:[%s2489_s6 + $0x2e0] sm:$0xf0] }
  0x71   : > { %v1946_v16 = vor.u32 %v2087_v7, %v1943_v8  ;;  %v2071_v20 = vld [vmem:[%s2489_s6 + $0x32c] sm:$0xf]  ;;  %v1813_v30 = vld [vmem:[%s2489_s6 + $0x2a8] sm:$0xf]  ;;  %v1743_v41 = vld [vmem:[%s2489_s6 + $0x260] sm:$0xf0] }
  0x72   : > { %1115 = vmatpush.bf16.msrb.mxu0 %v1726_v13  ;;  %1129 = vmatpush.bf16.msrb.mxu1 %v1730_v14  ;;  %v1869_v13 = vld [vmem:[%s2489_s6 + $0x320] sm:$0xf]  ;;  %v1879_v21 = vld [vmem:[%s2489_s6 + $0x368] sm:$0xf0]  ;;  %v1749_v42 = vld [vmem:[%s2489_s6 + $0x228] sm:$0xf] }
  0x73   : > { %1143 = vmatpush.bf16.msrb.mxu2 %v1734_v15  ;;  %v2078_v14 = vld [vmem:[%s2489_s6 + $0x35c] sm:$0xf0]  ;;  %v2070_v15 = vld [vmem:[%s2489_s6 + $0x324] sm:$0xf]  ;;  %v1882_v28 = vor.u32 %v2071_v20, %v1879_v21  ;;  %v2055_v32 = vld [vmem:[%s2489_s6 + $0x2ac] sm:$0xf] }
  0x74   : > { %1157 = vmatpush.bf16.msrb.mxu3 %v1738_v19  ;;  %v2079_v19 = vld [vmem:[%s2489_s6 + $0x364] sm:$0xf0]  ;;  %v1870_v22 = vor.u32 %v2078_v14, %v1869_v13  ;;  %v1874_v23 = vor.u32 %v2070_v15, %v1871_v17  ;;  %v1815_v33 = vld [vmem:[%s2489_s6 + $0x2e8] sm:$0xf0]  ;;  %v2030_v50 = vld [vmem:[%s2489_s6 + $0x1dc] sm:$0xf0] }
  0x75   : > { %v1878_v24 = vor.u32 %v2079_v19, %v1877_v18  ;;  %v1818_v40 = vor.u32 %v2055_v32, %v1815_v33  ;;  %v2039_v44 = vld [vmem:[%s2489_s6 + $0x22c] sm:$0xf]  ;;  %v2022_v51 = vld [vmem:[%s2489_s6 + $0x1a4] sm:$0xf]  ;;  %v1685_v54 = vld [vmem:[%s2489_s6 + $0x1a8] sm:$0xf] }
  0x76   : > { %1116 = vmatpush.bf16.msrb.mxu0 %v1662_v25  ;;  %1130 = vmatpush.bf16.msrb.mxu1 %v1666_v26  ;;  %v1805_v25 = vld [vmem:[%s2489_s6 + $0x2a0] sm:$0xf]  ;;  %v1751_v45 = vld [vmem:[%s2489_s6 + $0x268] sm:$0xf0]  ;;  %v2031_v55 = vld [vmem:[%s2489_s6 + $0x1e4] sm:$0xf0] }
  0x77   : > { %1144 = vmatpush.bf16.msrb.mxu2 %v1670_v27  ;;  %v2062_v26 = vld [vmem:[%s2489_s6 + $0x2dc] sm:$0xf0]  ;;  %v2054_v27 = vld [vmem:[%s2489_s6 + $0x2a4] sm:$0xf]  ;;  %v2023_v56 = vld [vmem:[%s2489_s6 + $0x1ac] sm:$0xf]  ;;  %v1686_v60 = vor.u32 %v2031_v55, %v1685_v54 }
  0x78   : > { %1158 = vmatpush.bf16.msrb.mxu3 %v1674_v31  ;;  %v2063_v31 = vld [vmem:[%s2489_s6 + $0x2e4] sm:$0xf0]  ;;  %v1806_v34 = vor.u32 %v2062_v26, %v1805_v25  ;;  %v1810_v35 = vor.u32 %v2054_v27, %v1807_v29  ;;  %v1613_v61 = vld [vmem:[%s2489_s6 + $0x120] sm:$0xf]  ;;  %v2006_v63 = vld [vmem:[%s2489_s6 + $0x124] sm:$0xf] }
  0x79   : > { %v1814_v36 = vor.u32 %v2063_v31, %v1813_v30  ;;  %v2014_v62 = vld [vmem:[%s2489_s6 + $0x15c] sm:$0xf0]  ;;  %v1615_v2 = vld [vmem:[%s2489_s6 + $0x160] sm:$0xf0]  ;;  %v1621_v3 = vld [vmem:[%s2489_s6 + $0x128] sm:$0xf] }
  0x7a   : > { %1117 = vmatpush.bf16.msrb.mxu0 %v1598_v37  ;;  %1131 = vmatpush.bf16.msrb.mxu1 %v1602_v38  ;;  %v1741_v37 = vld [vmem:[%s2489_s6 + $0x220] sm:$0xf]  ;;  %v2015_v4 = vld [vmem:[%s2489_s6 + $0x164] sm:$0xf0]  ;;  %v1614_v7 = vor.u32 %v2014_v62, %v1613_v61  ;;  %v1618_v8 = vor.u32 %v2006_v63, %v1615_v2  ;;  %v1551_v14 = vld [vmem:[%s2489_s6 + $0xe0] sm:$0xf0] }
  0x7b   : > { %1145 = vmatpush.bf16.msrb.mxu2 %v1606_v39  ;;  %v2046_v38 = vld [vmem:[%s2489_s6 + $0x25c] sm:$0xf0]  ;;  %v2038_v39 = vld [vmem:[%s2489_s6 + $0x224] sm:$0xf]  ;;  %v1557_v15 = vld [vmem:[%s2489_s6 + $0xa8] sm:$0xf] }
  0x7c   : > { %1159 = vmatpush.bf16.msrb.mxu3 %v1610_v43  ;;  %v2047_v43 = vld [vmem:[%s2489_s6 + $0x264] sm:$0xf0]  ;;  %v1742_v46 = vor.u32 %v2046_v38, %v1741_v37  ;;  %v1746_v47 = vor.u32 %v2038_v39, %v1743_v41  ;;  %v1991_v17 = vld [vmem:[%s2489_s6 + $0xac] sm:$0xf]  ;;  %v1485_v20 = vld [vmem:[%s2489_s6 + $0x20] sm:$0xf] }
  0x7d   : > { %v1750_v48 = vor.u32 %v2047_v43, %v1749_v42  ;;  %v1559_v18 = vld [vmem:[%s2489_s6 + $0xe8] sm:$0xf0]  ;;  %v1982_v21 = vld [vmem:[%s2489_s6 + $0x5c] sm:$0xf0]  ;;  %v1487_v25 = vld [vmem:[%s2489_s6 + $0x60] sm:$0xf0] }
  0x7e   : > { %1118 = vmatpush.bf16.msrb.mxu0 %v1534_v49  ;;  %1132 = vmatpush.bf16.msrb.mxu1 %v1538_v52  ;;  %v1677_v49 = vld [vmem:[%s2489_s6 + $0x1a0] sm:$0xf]  ;;  %v1754_v52 = vor.u32 %v2039_v44, %v1751_v45  ;;  %v1493_v26 = vld [vmem:[%s2489_s6 + $0x28] sm:$0xf]  ;;  %v1562_v27 = vor.u32 %v1991_v17, %v1559_v18  ;;  %v1975_v29 = vld [vmem:[%s2489_s6 + $0x2c] sm:$0xf] }
  0x7f   : > { %1146 = vmatpush.bf16.msrb.mxu2 %v1542_v53  ;;  %v1679_v53 = vld [vmem:[%s2489_s6 + $0x1e0] sm:$0xf0]  ;;  %v1678_v58 = vor.u32 %v2030_v50, %v1677_v49  ;;  %v1495_v30 = vld [vmem:[%s2489_s6 + $0x68] sm:$0xf0]  ;;  %v1949_v31 = vld [vmem:[%s2489_s6 + $0x3b0] sm:$0xf] }
  0x80   : > { %1160 = vmatpush.bf16.msrb.mxu3 %v1546_v57  ;;  %v1687_v57 = vld [vmem:[%s2489_s6 + $0x1e8] sm:$0xf0]  ;;  %v1682_v59 = vor.u32 %v2022_v51, %v1679_v53  ;;  %v2096_v32 = vld [vmem:[%s2489_s6 + $0x3ec] sm:$0xf0]  ;;  %v2088_v33 = vld [vmem:[%s2489_s6 + $0x3b4] sm:$0xf]  ;;  %v1498_v42 = vor.u32 %v1975_v29, %v1495_v30 }
  0x81   : > { %v2097_v37 = vld [vmem:[%s2489_s6 + $0x3f4] sm:$0xf0]  ;;  %v1959_v41 = vld [vmem:[%s2489_s6 + $0x3f8] sm:$0xf0]  ;;  %v1950_v43 = vor.u32 %v2096_v32, %v1949_v31  ;;  %v1887_v50 = vld [vmem:[%s2489_s6 + $0x370] sm:$0xf0] }
  0x82   : > { %1119 = vmatpush.bf16.msrb.mxu0 %v1470_v0  ;;  %1133 = vmatpush.bf16.msrb.mxu1 %v1474_v5  ;;  %v1690_v0 = vor.u32 %v2023_v56, %v1687_v57  ;;  %v2007_v5 = vld [vmem:[%s2489_s6 + $0x12c] sm:$0xf]  ;;  %v1893_v51 = vld [vmem:[%s2489_s6 + $0x338] sm:$0xf]  ;;  %v2073_v53 = vld [vmem:[%s2489_s6 + $0x33c] sm:$0xf] }
  0x83   : > { %1147 = vmatpush.bf16.msrb.mxu2 %v1478_v6  ;;  %v1623_v6 = vld [vmem:[%s2489_s6 + $0x168] sm:$0xf0]  ;;  %v1895_v54 = vld [vmem:[%s2489_s6 + $0x378] sm:$0xf0]  ;;  %v1823_v62 = vld [vmem:[%s2489_s6 + $0x2f0] sm:$0xf0] }
  0x84   : > { %1161 = vmatpush.bf16.msrb.mxu3 %v1482_v9  ;;  %v1622_v9 = vor.u32 %v2015_v4, %v1621_v3  ;;  %v1626_v13 = vor.u32 %v2007_v5, %v1623_v6  ;;  %v1898_v61 = vor.u32 %v2073_v53, %v1895_v54  ;;  %v1829_v63 = vld [vmem:[%s2489_s6 + $0x2b8] sm:$0xf]  ;;  %v2057_v2 = vld [vmem:[%s2489_s6 + $0x2bc] sm:$0xf]  ;;  %v1629_v31 = vld [vmem:[%s2489_s6 + $0x130] sm:$0xf] }
  0x85   : > { %1120 = vmatmul.bf16.vlgmr.msrb.gmra.mxu0 %v2583_v1  ;;  %1134 = vmatmul.bf16.vlgmr.msrb.gmra.mxu1 %v2583_v1  ;;  %v1831_v3 = vld [vmem:[%s2489_s6 + $0x2f8] sm:$0xf0]  ;;  %v2016_v32 = vld [vmem:[%s2489_s6 + $0x16c] sm:$0xf0]  ;;  %s1446_s29 = sshll.u32 %s2486_s18, 8  ;;  %s2098_s17 = sshll.u32 %s2421_s20, 8 }
  0x86   : > { %1168 = vmatpush.bf16.msra.mxu0 %v1934_v10  ;;  %1182 = vmatpush.bf16.msra.mxu1 %v1938_v11  ;;  %v1549_v10 = vld [vmem:[%s2489_s6 + $0xa0] sm:$0xf]  ;;  %s2774_s11 = scalar_lea.vmem [#allocation8], %s1446_s29  ;;  %s1324_s27 = scalar_lea.hbm %s2846_s3, %s2098_s17 }
  0x87   : > { %1196 = vmatpush.bf16.msra.mxu2 %v1942_v12  ;;  %1162 = vmatmul.bf16.vlgmr.msrb.gmra.mxu3 %v2583_v1  ;;  %v1998_v11 = vld [vmem:[%s2489_s6 + $0xdc] sm:$0xf0]  ;;  %v1990_v12 = vld [vmem:[%s2489_s6 + $0xa4] sm:$0xf]  ;;  %s1325_s20 = sshll.u32 %s2774_s11, 4  ;;  %s1327_s5 = sshll.u32 %s1324_s27, 4  ;;  %s1326_s20 = int_to_ptr.vmem [resolvable:$true] %s1325_s20  ;;  %s1328_s5 = int_to_ptr.hbm [resolvable:$true] %s1327_s5 }
  0x88   : > { %1210 = vmatpush.bf16.msra.mxu3 %v1946_v16  ;;  %1148 = vmatmul.bf16.vlgmr.msrb.gmra.mxu2 %v2583_v1  ;;  %v1999_v16 = vld [vmem:[%s2489_s6 + $0xe4] sm:$0xf0]  ;;  %v1550_v19 = vor.u32 %v1998_v11, %v1549_v10  ;;  %v1834_v10 = vor.u32 %v2057_v2, %v1831_v3  ;;  %v1759_v11 = vld [vmem:[%s2489_s6 + $0x270] sm:$0xf0]  ;;  %s1313_s21 = scalar_lea.sflag [#allocation4], %s2486_s18  ;;  %s2270_s9 = sshra.s32 %s1328_s5, 4  ;;  %s2271_s9 = int_to_ptr.hbm [resolvable:$true] %s2270_s9 }
  0x89   : > { %s2272_s7 = scalar_lea.hbm %s2271_s9, 256  ;;  %s2276_s0 = scalar_lea.hbm %s2846_s3, 512 }
  0x8a   : > { %1169 = vmatpush.bf16.msra.mxu0 %v1870_v22  ;;  %1183 = vmatpush.bf16.msra.mxu1 %v1874_v23  ;;  %v1554_v22 = vor.u32 %v1990_v12, %v1551_v14  ;;  %v1558_v23 = vor.u32 %v1999_v16, %v1557_v15  ;;  %v1765_v12 = vld [vmem:[%s2489_s6 + $0x238] sm:$0xf]  ;;  %v2041_v14 = vld [vmem:[%s2489_s6 + $0x23c] sm:$0xf]  ;;  %p2273_p3 = scmp.ne.s32.totalorder %s2271_s9, %s2272_s7  ;;  %p2277_p4 = scmp.lt.s32.totalorder %s2271_s9, %s2846_s3 }
  0x8b   : > { %1197 = vmatpush.bf16.msra.mxu2 %v1878_v24  ;;  %v1974_v24 = vld [vmem:[%s2489_s6 + $0x24] sm:$0xf]  ;;  %v1767_v15 = vld [vmem:[%s2489_s6 + $0x278] sm:$0xf0]  ;;  %p2278_p9 = scmp.lt.s32.totalorder %s2276_s0, %s2272_s7 }
  0x8c   : > { %1211 = vmatpush.bf16.msra.mxu3 %v1882_v28  ;;  %v1983_v28 = vld [vmem:[%s2489_s6 + $0x64] sm:$0xf0]  ;;  %v1490_v38 = vor.u32 %v1974_v24, %v1487_v25  ;;  %v1701_v24 = vld [vmem:[%s2489_s6 + $0x1b8] sm:$0xf]  ;;  %p2274_p6 = pnand %p2273_p3, %p2438_p11 }
  0x8d   : > { %v1494_v39 = vor.u32 %v1983_v28, %v1493_v26  ;;  %v2033_v25 = vld [vmem:[%s2489_s6 + $0x1f4] sm:$0xf0]  ;;  %v2025_v26 = vld [vmem:[%s2489_s6 + $0x1bc] sm:$0xf]  ;;  %p2279_p1 = por %p2278_p9, %p2277_p4 }
  0x8e   : > { %1170 = vmatpush.bf16.msra.mxu0 %v1806_v34  ;;  %1184 = vmatpush.bf16.msra.mxu1 %v1810_v35  ;;  %v1486_v34 = vor.u32 %v1982_v21, %v1485_v20  ;;  %v1951_v35 = vld [vmem:[%s2489_s6 + $0x3f0] sm:$0xf0]  ;;  %v2032_v20 = vld [vmem:[%s2489_s6 + $0x1ec] sm:$0xf0]  ;;  %v1702_v30 = vor.u32 %v2033_v25, %v1701_v24  ;;  %p2275_p8 = pneg %p2274_p6 }
  0x8f   : > { %1198 = vmatpush.bf16.msra.mxu2 %v1814_v36  ;;  %v1957_v36 = vld [vmem:[%s2489_s6 + $0x3b8] sm:$0xf]  ;;  %v1954_v44 = vor.u32 %v2088_v33, %v1951_v35  ;;  %v2024_v21 = vld [vmem:[%s2489_s6 + $0x1b4] sm:$0xf] }
  0x90   : > { %1212 = vmatpush.bf16.msra.mxu3 %v1818_v40  ;;  %v2089_v40 = vld [vmem:[%s2489_s6 + $0x3bc] sm:$0xf]  ;;  %v1958_v45 = vor.u32 %v2097_v37, %v1957_v36  ;;  %v2008_v33 = vld [vmem:[%s2489_s6 + $0x134] sm:$0xf]  ;;  %v1637_v36 = vld [vmem:[%s2489_s6 + $0x138] sm:$0xf]  ;;  %p2280_p5 = pnand %p2279_p1, %p2275_p8 }
  0x91   : > { %v1962_v49 = vor.u32 %v2089_v40, %v1959_v41  ;;  %v1631_v35 = vld [vmem:[%s2489_s6 + $0x170] sm:$0xf0]  ;;  %v2017_v37 = vld [vmem:[%s2489_s6 + $0x174] sm:$0xf0]  ;;  %v1630_v40 = vor.u32 %v2016_v32, %v1629_v31 }
  0x92   : > { %1171 = vmatpush.bf16.msra.mxu0 %v1742_v46  ;;  %1185 = vmatpush.bf16.msra.mxu1 %v1746_v47  ;;  %v1885_v46 = vld [vmem:[%s2489_s6 + $0x330] sm:$0xf]  ;;  %v1634_v41 = vor.u32 %v2008_v33, %v1631_v35 }
  0x93   : > { %1199 = vmatpush.bf16.msra.mxu2 %v1750_v48  ;;  %v2080_v47 = vld [vmem:[%s2489_s6 + $0x36c] sm:$0xf0]  ;;  %v2072_v48 = vld [vmem:[%s2489_s6 + $0x334] sm:$0xf] }
  0x94   : > { %1213 = vmatpush.bf16.msra.mxu3 %v1754_v52  ;;  %v2081_v52 = vld [vmem:[%s2489_s6 + $0x374] sm:$0xf0]  ;;  %v1886_v55 = vor.u32 %v2080_v47, %v1885_v46  ;;  %v1890_v56 = vor.u32 %v2072_v48, %v1887_v50  ;;  %v1567_v47 = vld [vmem:[%s2489_s6 + $0xf0] sm:$0xf0]  ;;  %v1993_v50 = vld [vmem:[%s2489_s6 + $0xbc] sm:$0xf] }
  0x95   : > { %v1894_v57 = vor.u32 %v2081_v52, %v1893_v51  ;;  %v1573_v48 = vld [vmem:[%s2489_s6 + $0xb8] sm:$0xf]  ;;  %v1575_v51 = vld [vmem:[%s2489_s6 + $0xf8] sm:$0xf0] }
  0x96   : > { %1172 = vmatpush.bf16.msra.mxu0 %v1678_v58  ;;  %1186 = vmatpush.bf16.msra.mxu1 %v1682_v59  ;;  %v1821_v58 = vld [vmem:[%s2489_s6 + $0x2b0] sm:$0xf] }
  0x97   : > { %1200 = vmatpush.bf16.msra.mxu2 %v1686_v60  ;;  %v2064_v59 = vld [vmem:[%s2489_s6 + $0x2ec] sm:$0xf0]  ;;  %v2056_v60 = vld [vmem:[%s2489_s6 + $0x2b4] sm:$0xf] }
  0x98   : > { %1214 = vmatpush.bf16.msra.mxu3 %v1690_v0  ;;  %v2065_v0 = vld [vmem:[%s2489_s6 + $0x2f4] sm:$0xf0]  ;;  %v1822_v4 = vor.u32 %v2064_v59, %v1821_v58  ;;  %v1826_v5 = vor.u32 %v2056_v60, %v1823_v62  ;;  %v1578_v58 = vor.u32 %v1993_v50, %v1575_v51  ;;  %v1503_v59 = vld [vmem:[%s2489_s6 + $0x70] sm:$0xf0]  ;;  %v1977_v62 = vld [vmem:[%s2489_s6 + $0x3c] sm:$0xf] }
  0x99   : > { %v1830_v6 = vor.u32 %v2065_v0, %v1829_v63  ;;  %v1509_v60 = vld [vmem:[%s2489_s6 + $0x38] sm:$0xf]  ;;  %v1511_v63 = vld [vmem:[%s2489_s6 + $0x78] sm:$0xf0] }
  0x9a   : > { %1173 = vmatpush.bf16.msra.mxu0 %v1614_v7  ;;  %1187 = vmatpush.bf16.msra.mxu1 %v1618_v8  ;;  %v1757_v7 = vld [vmem:[%s2489_s6 + $0x230] sm:$0xf] }
  0x9b   : > { %1201 = vmatpush.bf16.msra.mxu2 %v1622_v9  ;;  %v2048_v8 = vld [vmem:[%s2489_s6 + $0x26c] sm:$0xf0]  ;;  %v2040_v9 = vld [vmem:[%s2489_s6 + $0x234] sm:$0xf] }
  0x9c   : > { %1215 = vmatpush.bf16.msra.mxu3 %v1626_v13  ;;  %v2049_v13 = vld [vmem:[%s2489_s6 + $0x274] sm:$0xf0]  ;;  %v1758_v16 = vor.u32 %v2048_v8, %v1757_v7  ;;  %v1762_v17 = vor.u32 %v2040_v9, %v1759_v11 }
  0x9d   : > { %v1766_v18 = vor.u32 %v2049_v13, %v1765_v12 }
  0x9e   : > { %1174 = vmatpush.bf16.msra.mxu0 %v1550_v19  ;;  %1188 = vmatpush.bf16.msra.mxu1 %v1554_v22  ;;  %v1693_v19 = vld [vmem:[%s2489_s6 + $0x1b0] sm:$0xf]  ;;  %v1770_v22 = vor.u32 %v2041_v14, %v1767_v15 }
  0x9f   : > { %1202 = vmatpush.bf16.msra.mxu2 %v1558_v23  ;;  %v1695_v23 = vld [vmem:[%s2489_s6 + $0x1f0] sm:$0xf0]  ;;  %v1694_v28 = vor.u32 %v2032_v20, %v1693_v19 }
  0xa0   : > { %1216 = vmatpush.bf16.msra.mxu3 %v1562_v27  ;;  %v1703_v27 = vld [vmem:[%s2489_s6 + $0x1f8] sm:$0xf0]  ;;  %v1698_v29 = vor.u32 %v2024_v21, %v1695_v23 }
  0xa2   : > { %1175 = vmatpush.bf16.msra.mxu0 %v1486_v34  ;;  %1189 = vmatpush.bf16.msra.mxu1 %v1490_v38  ;;  %v1706_v34 = vor.u32 %v2025_v26, %v1703_v27  ;;  %v2009_v38 = vld [vmem:[%s2489_s6 + $0x13c] sm:$0xf] }
  0xa3   : > { %1203 = vmatpush.bf16.msra.mxu2 %v1494_v39  ;;  %v1639_v39 = vld [vmem:[%s2489_s6 + $0x178] sm:$0xf0] }
  0xa4   : > { %1217 = vmatpush.bf16.msra.mxu3 %v1498_v42  ;;  %v1638_v42 = vor.u32 %v2017_v37, %v1637_v36  ;;  %v1642_v46 = vor.u32 %v2009_v38, %v1639_v39 }
  0xa5   : > { %1176 = vmatmul.bf16.vlgmr.msra.gmra.mxu0 %v2583_v1  ;;  %1190 = vmatmul.bf16.vlgmr.msra.gmra.mxu1 %v2583_v1 }
  0xa6   : > { %1224 = vmatpush.bf16.msrb.mxu0 %v1950_v43  ;;  %1238 = vmatpush.bf16.msrb.mxu1 %v1954_v44  ;;  %v1565_v43 = vld [vmem:[%s2489_s6 + $0xb0] sm:$0xf] }
  0xa7   : > { %1252 = vmatpush.bf16.msrb.mxu2 %v1958_v45  ;;  %1218 = vmatmul.bf16.vlgmr.msra.gmra.mxu3 %v2583_v1  ;;  %v2000_v44 = vld [vmem:[%s2489_s6 + $0xec] sm:$0xf0]  ;;  %v1992_v45 = vld [vmem:[%s2489_s6 + $0xb4] sm:$0xf] }
  0xa8   : > { %1266 = vmatpush.bf16.msrb.mxu3 %v1962_v49  ;;  %1204 = vmatmul.bf16.vlgmr.msra.gmra.mxu2 %v2583_v1  ;;  %v2001_v49 = vld [vmem:[%s2489_s6 + $0xf4] sm:$0xf0]  ;;  %v1566_v52 = vor.u32 %v2000_v44, %v1565_v43  ;;  %v1570_v53 = vor.u32 %v1992_v45, %v1567_v47 }
  0xa9   : > { %v1574_v54 = vor.u32 %v2001_v49, %v1573_v48  ;;  %v375_v45 = vld [vmem:[%s2770_s23 + $0x8] sm:$0xff] }
  0xaa   : > { %1225 = vmatpush.bf16.msrb.mxu0 %v1886_v55  ;;  %1239 = vmatpush.bf16.msrb.mxu1 %v1890_v56  ;;  %v1501_v55 = vld [vmem:[%s2489_s6 + $0x30] sm:$0xf]  ;;  %v387_v47 = vperm.slane %v375_v45, 1 }
  0xab   : > { %1253 = vmatpush.bf16.msrb.mxu2 %v1894_v57  ;;  %v1984_v56 = vld [vmem:[%s2489_s6 + $0x6c] sm:$0xf0]  ;;  %v1976_v57 = vld [vmem:[%s2489_s6 + $0x34] sm:$0xf] }
  0xac   : > { %1267 = vmatpush.bf16.msrb.mxu3 %v1898_v61  ;;  %v1985_v61 = vld [vmem:[%s2489_s6 + $0x74] sm:$0xf0]  ;;  %v1502_v0 = vor.u32 %v1984_v56, %v1501_v55  ;;  %v1506_v2 = vor.u32 %v1976_v57, %v1503_v59 }
  0xad   : > { %v1510_v3 = vor.u32 %v1985_v61, %v1509_v60 }
  0xae   : > { %1226 = vmatpush.bf16.msrb.mxu0 %v1822_v4  ;;  %1240 = vmatpush.bf16.msrb.mxu1 %v1826_v5  ;;  %v1514_v4 = vor.u32 %v1977_v62, %v1511_v63  ;;  %v374_v5 = vld [vmem:[%s2770_s23] sm:$0xff] }
  0xaf   : > { %1254 = vmatpush.bf16.msrb.mxu2 %v1830_v6  ;;  %v378_v6 = vperm.slane %v374_v5, 0  ;;  %v379_v7 = vperm.slane %v374_v5, 1  ;;  %v380_v12 = vperm.slane %v374_v5, 2  ;;  %v382_v25 = vperm.slane %v374_v5, 4 }
  0xb0   : > { %1268 = vmatpush.bf16.msrb.mxu3 %v1834_v10  ;;  %v383_v26 = vperm.slane %v374_v5, 5  ;;  %v384_v31 = vperm.slane %v374_v5, 6  ;;  %v385_v32 = vperm.slane %v374_v5, 7 }
  0xb2   : > { %1227 = vmatpush.bf16.msrb.mxu0 %v1758_v16  ;;  %1241 = vmatpush.bf16.msrb.mxu1 %v1762_v17 }
  0xb3   : > { %1255 = vmatpush.bf16.msrb.mxu2 %v1766_v18 }
  0xb4   : > { %1269 = vmatpush.bf16.msrb.mxu3 %v1770_v22 }
  0xb6   : > { %1228 = vmatpush.bf16.msrb.mxu0 %v1694_v28  ;;  %1242 = vmatpush.bf16.msrb.mxu1 %v1698_v29 }
  0xb7   : > { %1256 = vmatpush.bf16.msrb.mxu2 %v1702_v30 }
  0xb8   : > { %1270 = vmatpush.bf16.msrb.mxu3 %v1706_v34 }
  0xba   : > { %1229 = vmatpush.bf16.msrb.mxu0 %v1630_v40  ;;  %1243 = vmatpush.bf16.msrb.mxu1 %v1634_v41 }
  0xbb   : > { %1257 = vmatpush.bf16.msrb.mxu2 %v1638_v42 }
  0xbc   : > { %1271 = vmatpush.bf16.msrb.mxu3 %v1642_v46  ;;  %v386_v46 = vperm.slane %v375_v45, 0 }
  0xbe   : > { %1230 = vmatpush.bf16.msrb.mxu0 %v1566_v52  ;;  %1244 = vmatpush.bf16.msrb.mxu1 %v1570_v53  ;;  %v388_v52 = vperm.slane %v375_v45, 2  ;;  %v389_v53 = vperm.slane %v375_v45, 3 }
  0xbf   : > { %1258 = vmatpush.bf16.msrb.mxu2 %v1574_v54 }
  0xc0   : > { %1272 = vmatpush.bf16.msrb.mxu3 %v1578_v58 }
  0xc2   : > { %1231 = vmatpush.bf16.msrb.mxu0 %v1502_v0  ;;  %1245 = vmatpush.bf16.msrb.mxu1 %v1506_v2 }
  0xc3   : > { %1259 = vmatpush.bf16.msrb.mxu2 %v1510_v3  ;;  %v390_v3 = vperm.slane %v375_v45, 4 }
  0xc4   : > { %1273 = vmatpush.bf16.msrb.mxu3 %v1514_v4  ;;  %v391_v4 = vperm.slane %v375_v45, 5 }
  0xc5   : > { %1232 = vmatmul.bf16.vlgmr.msrb.gmra.mxu0 %v2583_v1  ;;  %1246 = vmatmul.bf16.vlgmr.msrb.gmra.mxu1 %v2583_v1 }
  0xc6   : > { %1260 = vmatmul.bf16.vlgmr.msrb.gmra.mxu2 %v2583_v1 }
  0xc7   : > { %1274 = vmatmul.bf16.vlgmr.msrb.gmra.mxu3 %v2583_v1  ;;  %v381_v1 = vperm.slane %v374_v5, 3 }
  0xe2   : > { %v1065_v8 = vpop.f32.mrf.mxu0  ;;  %v1079_v10 = vpop.f32.mrf.mxu1 }
  0xe3   : > { %v1066_v9 = vadd.f32 %v1065_v8, %v378_v6  ;;  %v1080_v11 = vadd.f32 %v1079_v10, %v379_v7  ;;  %v393_v10 = vperm.slane %v375_v45, 7 }
  0xe5   : > { %1280 = vst [vmem:[%s2774_s11] sm:$0xff] %v1066_v9  ;;  %v392_v9 = vperm.slane %v375_v45, 6 }
  0xe6   : > { %1281 = vst [vmem:[%s2774_s11 + $0x8] sm:$0xff] %v1080_v11 }
  0xea   : > { %v1107_v15 = vpop.f32.mrf.mxu3  ;;  %v1067_v17 = vpop.f32.mrf.mxu0 }
  0xeb   : > { %v1093_v13 = vpop.f32.mrf.mxu2  ;;  %v1108_v16 = vadd.f32 %v1107_v15, %v381_v1  ;;  %v1068_v18 = vadd.f32 %v1067_v17, %v378_v6  ;;  %v1081_v19 = vpop.f32.mrf.mxu1 }
  0xec   : > { %v1094_v14 = vadd.f32 %v1093_v13, %v380_v12  ;;  %v1082_v20 = vadd.f32 %v1081_v19, %v379_v7 }
  0xed   : > { %1283 = vst [vmem:[%s2774_s11 + $0x18] sm:$0xff] %v1108_v16 }
  0xee   : > { %1282 = vst [vmem:[%s2774_s11 + $0x10] sm:$0xff] %v1094_v14 }
  0xef   : > { %1296 = vst [vmem:[%s2774_s11 + $0x80] sm:$0xff] %v1068_v18 }
  0xf0   : > { %1297 = vst [vmem:[%s2774_s11 + $0x88] sm:$0xff] %v1082_v20 }
  0xf2   : > { %v1109_v23 = vpop.f32.mrf.mxu3 }
  0xf3   : > { %v1095_v21 = vpop.f32.mrf.mxu2  ;;  %v1110_v24 = vadd.f32 %v1109_v23, %v381_v1 }
  0xf4   : > { %v1096_v22 = vadd.f32 %v1095_v21, %v380_v12 }
  0xf5   : > { %1299 = vst [vmem:[%s2774_s11 + $0x98] sm:$0xff] %v1110_v24 }
  0xf6   : > { %1298 = vst [vmem:[%s2774_s11 + $0x90] sm:$0xff] %v1096_v22 }
 0x102   : > { %v1121_v27 = vpop.f32.mrf.mxu0  ;;  %v1135_v29 = vpop.f32.mrf.mxu1 }
 0x103   : > { %v1122_v28 = vadd.f32 %v1121_v27, %v382_v25  ;;  %v1136_v30 = vadd.f32 %v1135_v29, %v383_v26 }
 0x105   : > { %1284 = vst [vmem:[%s2774_s11 + $0x20] sm:$0xff] %v1122_v28 }
 0x106   : > { %1285 = vst [vmem:[%s2774_s11 + $0x28] sm:$0xff] %v1136_v30 }
 0x10a   : > { %v1163_v35 = vpop.f32.mrf.mxu3  ;;  %v1123_v37 = vpop.f32.mrf.mxu0 }
 0x10b   : > { %v1149_v33 = vpop.f32.mrf.mxu2  ;;  %v1164_v36 = vadd.f32 %v1163_v35, %v385_v32  ;;  %v1124_v38 = vadd.f32 %v1123_v37, %v382_v25  ;;  %v1137_v39 = vpop.f32.mrf.mxu1 }
 0x10c   : > { %v1150_v34 = vadd.f32 %v1149_v33, %v384_v31  ;;  %v1138_v40 = vadd.f32 %v1137_v39, %v383_v26 }
 0x10d   : > { %1287 = vst [vmem:[%s2774_s11 + $0x38] sm:$0xff] %v1164_v36 }
 0x10e   : > { %1286 = vst [vmem:[%s2774_s11 + $0x30] sm:$0xff] %v1150_v34 }
 0x10f   : > { %1300 = vst [vmem:[%s2774_s11 + $0xa0] sm:$0xff] %v1124_v38 }
 0x110   : > { %1301 = vst [vmem:[%s2774_s11 + $0xa8] sm:$0xff] %v1138_v40 }
 0x112   : > { %v1165_v43 = vpop.f32.mrf.mxu3 }
 0x113   : > { %v1151_v41 = vpop.f32.mrf.mxu2  ;;  %v1166_v44 = vadd.f32 %v1165_v43, %v385_v32 }
 0x114   : > { %v1152_v42 = vadd.f32 %v1151_v41, %v384_v31 }
 0x115   : > { %1303 = vst [vmem:[%s2774_s11 + $0xb8] sm:$0xff] %v1166_v44 }
 0x116   : > { %1302 = vst [vmem:[%s2774_s11 + $0xb0] sm:$0xff] %v1152_v42 }
 0x122   : > { %v1177_v48 = vpop.f32.mrf.mxu0  ;;  %v1191_v50 = vpop.f32.mrf.mxu1 }
 0x123   : > { %v1178_v49 = vadd.f32 %v1177_v48, %v386_v46  ;;  %v1192_v51 = vadd.f32 %v1191_v50, %v387_v47 }
 0x125   : > { %1288 = vst [vmem:[%s2774_s11 + $0x40] sm:$0xff] %v1178_v49 }
 0x126   : > { %1289 = vst [vmem:[%s2774_s11 + $0x48] sm:$0xff] %v1192_v51 }
 0x12a   : > { %v1219_v56 = vpop.f32.mrf.mxu3  ;;  %v1179_v58 = vpop.f32.mrf.mxu0 }
 0x12b   : > { %v1205_v54 = vpop.f32.mrf.mxu2  ;;  %v1220_v57 = vadd.f32 %v1219_v56, %v389_v53  ;;  %v1180_v59 = vadd.f32 %v1179_v58, %v386_v46  ;;  %v1193_v60 = vpop.f32.mrf.mxu1 }
 0x12c   : > { %v1206_v55 = vadd.f32 %v1205_v54, %v388_v52  ;;  %v1194_v61 = vadd.f32 %v1193_v60, %v387_v47 }
 0x12d   : > { %1291 = vst [vmem:[%s2774_s11 + $0x58] sm:$0xff] %v1220_v57 }
 0x12e   : > { %1290 = vst [vmem:[%s2774_s11 + $0x50] sm:$0xff] %v1206_v55 }
 0x12f   : > { %1304 = vst [vmem:[%s2774_s11 + $0xc0] sm:$0xff] %v1180_v59 }
 0x130   : > { %1305 = vst [vmem:[%s2774_s11 + $0xc8] sm:$0xff] %v1194_v61 }
 0x132   : > { %v1221_v0 = vpop.f32.mrf.mxu3 }
 0x133   : > { %v1207_v62 = vpop.f32.mrf.mxu2  ;;  %v1222_v2 = vadd.f32 %v1221_v0, %v389_v53 }
 0x134   : > { %v1208_v63 = vadd.f32 %v1207_v62, %v388_v52 }
 0x135   : > { %1307 = vst [vmem:[%s2774_s11 + $0xd8] sm:$0xff] %v1222_v2 }
 0x136   : > { %1306 = vst [vmem:[%s2774_s11 + $0xd0] sm:$0xff] %v1208_v63 }
 0x142   : > { %v1233_v5 = vpop.f32.mrf.mxu0  ;;  %v1247_v7 = vpop.f32.mrf.mxu1 }
 0x143   : > { %v1234_v6 = vadd.f32 %v1233_v5, %v390_v3  ;;  %v1248_v8 = vadd.f32 %v1247_v7, %v391_v4 }
 0x145   : > { %1292 = vst [vmem:[%s2774_s11 + $0x60] sm:$0xff] %v1234_v6 }
 0x146   : > { %1293 = vst [vmem:[%s2774_s11 + $0x68] sm:$0xff] %v1248_v8 }
 0x149   : > { %v1261_v11 = vpop.f32.mrf.mxu2 }
 0x14a   : > { %v1262_v12 = vadd.f32 %v1261_v11, %v392_v9  ;;  %v1275_v1 = vpop.f32.mrf.mxu3  ;;  %v1235_v13 = vpop.f32.mrf.mxu0 }
 0x14b   : > { %v1276_v14 = vadd.f32 %v1275_v1, %v393_v10  ;;  %v1236_v15 = vadd.f32 %v1235_v13, %v390_v3  ;;  %v1249_v16 = vpop.f32.mrf.mxu1 }
 0x14c   : > { %1294 = vst [vmem:[%s2774_s11 + $0x70] sm:$0xff] %v1262_v12  ;;  %v1250_v17 = vadd.f32 %v1249_v16, %v391_v4 }
 0x14d   : > { %1295 = vst [vmem:[%s2774_s11 + $0x78] sm:$0xff] %v1276_v14 }
 0x14e   : > { %1308 = vst [vmem:[%s2774_s11 + $0xe0] sm:$0xff] %v1236_v15 }
 0x14f   : > { %1309 = vst [vmem:[%s2774_s11 + $0xe8] sm:$0xff] %v1250_v17 }
 0x151   : > { %v1263_v18 = vpop.f32.mrf.mxu2 }
 0x152   : > { %v1264_v19 = vadd.f32 %v1263_v18, %v392_v9  ;;  %v1277_v20 = vpop.f32.mrf.mxu3 }
 0x153   : > { %v1278_v21 = vadd.f32 %v1277_v20, %v393_v10 }
 0x154   : > { %1310 = vst [vmem:[%s2774_s11 + $0xf0] sm:$0xff] %v1264_v19 }
 0x155   : > { %1311 = vst [vmem:[%s2774_s11 + $0xf8] sm:$0xff] %v1278_v21 }
 0x156   : > { %2283 = shalt.err (!%p2280_p5)
}
 0x157   : > { %s2332_s18 = smov 2048   ;;  %s2333_s6 = smov 128  }
 0x158   : > { %2107 = dma.vmem_to_hbm [thread:$0]  (%p2438_p11), %s1326_s20, 4096, %s1328_s5, %s1313_s21, %s2332_s18, %s2332_s18, %s2333_s6  }
 0x159 PF: > { %s1342_s4 = sand.u32 1, %s2314_s12   ;;  %p2854_p7 = scmp.ge.s32.totalorder %s2326_s15, 2 }
 0x15a   : > { %s1343_s23 = scalar_lea.sflag [#allocation4], %s1342_s4 }
 0x15b   : > { %p2121_p10 = pnand %p2854_p7, %p2442_p12 }
 0x15d   : > { %p2122_p13 = pneg %p2121_p10 }
 0x15f   : > { %2309 = dma.done.wait (%p2122_p13), %s1343_s23, 4096  }
 0x160   : > { %2311 = vsyncadd (%p2122_p13), %s1343_s23, 4294963200  ;;  %p17_p0 = scmp.ge.s32.totalorder %s2375_s16, 4   ;;  %s2855_s12 = smov %s2318_s13 }
 0x161   : > { %s2856_s13 = smov %s2322_s14  ;;  %s2857_s14 = smov %s2385_s19 }
 0x162   : > { %s2858_s15 = smov %s2375_s16  ;;  %19 = sbr.rel (!%p17_p0) target bundleno = 8 (0x8), region = 93 }
 0x167   :  { %1349 = vsyncpa [#allocation3], 1 }
 0x168   :  { %1351 = vsyncpa [#allocation3 + $0x1], 1 }
 0x169   :  { %1352 = vsyncpa [#allocation6], 1 }
 0x16a   :  { %1354 = vsyncpa [#allocation6 + $0x1], 1 }
 0x16b   :  { %1355 = vsyncpa [#allocation4], 1 }
 0x16c   :  { %1357 = vsyncpa [#allocation4 + $0x1], 1 }

</bundles_post_ra>
